<compile_context>
chip_gen: v5e
topology: v5e:2x2
jax: 0.10.0
libtpu: 0.0.40
codegen_flags: <defaults>
</compile_context>

<pallas_src>
import jax
import jax.numpy as jnp
from jax import lax
from jax.experimental import pallas as pl
from jax.experimental.pallas import tpu as pltpu

_LANES = 128


def _round_up(x, m):
    return ((x + m - 1) // m) * m


def _make_focal_kernel(total_rows, tile_rows, n_tiles):
    """All arguments are static Python ints. Blocks are (tile_rows, 128)."""
    sub = tile_rows // 8
    rem = total_rows % tile_rows          # 0 -> every block is fully valid
    tail_valid_rows = total_rows - (n_tiles - 1) * tile_rows

    def partial_sums(pred, gt, valid):
        # pred/gt: (tile_rows, 128) f32. Returns two (8, 128) vreg partials.
        one_m_pred = 1.0 - pred
        one_m_gt = 1.0 - gt
        neg_w = one_m_gt * one_m_gt
        neg_w = neg_w * neg_w                       # (1 - gt)^4
        pos_f = one_m_pred * one_m_pred             # (1 - pred)^2
        neg_f = pred * pred * neg_w                 # pred^2 * (1 - gt)^4
        if valid is None:
            # Fast path (fully valid tile): heatmap gt <= 1, so neg == !pos.
            pos = gt == 1.0
            log_arg = jnp.where(pos, pred, one_m_pred)
            factor = jnp.where(pos, pos_f, neg_f)
        else:
            # Tail tile: rows past `total_rows` hold stale DMA data; force
            # their log argument to 1.0 and factor to 0.0 -> contribution 0.
            pos = jnp.logical_and(gt == 1.0, valid)
            log_arg = jnp.where(pos, pred, jnp.where(valid, one_m_pred, 1.0))
            factor = jnp.where(pos, pos_f, jnp.where(valid, neg_f, 0.0))
        contrib = jnp.log(log_arg) * factor          # single EUP log / element
        npos = jnp.where(pos, 1.0, 0.0)
        # Collapse the tile to a single vreg with pure VPU tree-adds; the
        # read-modify-write on the resident (8,128) accumulator is then tiny.
        c8 = jnp.sum(contrib.reshape(sub, 8, _LANES), axis=0)
        n8 = jnp.sum(npos.reshape(sub, 8, _LANES), axis=0)
        return c8, n8

    def kernel(pred_ref, gt_ref, loss_ref, npos_ref):
        i = pl.program_id(0)

        @pl.when(i == 0)
        def _():
            loss_ref[...] = jnp.zeros_like(loss_ref)
            npos_ref[...] = jnp.zeros_like(npos_ref)

        pred = pred_ref[...].astype(jnp.float32)
        gt = gt_ref[...].astype(jnp.float32)

        if rem == 0:
            c8, n8 = partial_sums(pred, gt, None)
            loss_ref[...] += c8
            npos_ref[...] += n8
        else:
            @pl.when(i != n_tiles - 1)
            def _():
                c8, n8 = partial_sums(pred, gt, None)
                loss_ref[...] += c8
                npos_ref[...] += n8

            @pl.when(i == n_tiles - 1)
            def _():
                valid = (lax.broadcasted_iota(jnp.int32, pred.shape, 0)
                         < tail_valid_rows)
                c8, n8 = partial_sums(pred, gt, valid)
                loss_ref[...] += c8
                npos_ref[...] += n8

    return kernel


def focal_loss(pred, gt, *, tile_rows=None, block_target_bytes=4 << 20):
    """CornerNet-style focal loss. pred, gt: (batch, c, h) (any shape), pred in (0, 1)."""
    assert pred.shape == gt.shape
    n_elem = pred.size

    # Lane-dense layout, independent of the trailing dim: flatten and view as
    # (rows, 128). Zero-padding (pred=0, gt=0) contributes exactly 0 to both
    # the loss sum and num_pos, so no lane mask is needed in the kernel.
    p = pred.reshape(-1)
    g = gt.reshape(-1)
    pad = (-n_elem) % _LANES
    if pad:
        p = jnp.pad(p, (0, pad))
        g = jnp.pad(g, (0, pad))
    rows = (n_elem + pad) // _LANES
    p2 = p.reshape(rows, _LANES)
    g2 = g.reshape(rows, _LANES)

    itemsize = max(p2.dtype.itemsize, g2.dtype.itemsize)
    if tile_rows is None:
        # ~4 MiB per input block (largest dtype): the kernel is HBM-bound on
        # v5e/v6e with f32 inputs, so big blocks push toward the ~85% of HBM
        # roofline plateau while staying well inside v7x's 64 MiB VMEM.
        tile_rows = block_target_bytes // (_LANES * itemsize)
    tile_rows = max(8, (int(tile_rows) // 8) * 8)
    tile_rows = min(tile_rows, _round_up(rows, 8))

    n_tiles = (rows + tile_rows - 1) // tile_rows
    kernel = _make_focal_kernel(rows, tile_rows, n_tiles)

    block_in_bytes = tile_rows * _LANES * (p2.dtype.itemsize + g2.dtype.itemsize)
    # 2 pipeline buffers per input + resident (8,128) outputs + headroom.
    # Explicit so v5e's 16 MiB scoped-VMEM default doesn't cap the blocks.
    vmem_limit = int(max(2 * block_in_bytes + (8 << 20), 32 << 20))

    n_padded = rows * _LANES
    # TODO(synk): on v7x (2 TensorCores) add a leading CORE_PARALLEL grid axis
    # to split tiles across both cores; kept single-core here for portability.
    loss_part, npos_part = pl.pallas_call(
        kernel,
        out_shape=(jax.ShapeDtypeStruct((8, _LANES), jnp.float32),
                   jax.ShapeDtypeStruct((8, _LANES), jnp.float32)),
        grid_spec=pltpu.PrefetchScalarGridSpec(
            num_scalar_prefetch=0,
            grid=(n_tiles,),
            in_specs=[
                pl.BlockSpec((tile_rows, _LANES), lambda i: (i, 0)),
                pl.BlockSpec((tile_rows, _LANES), lambda i: (i, 0)),
            ],
            out_specs=[
                pl.BlockSpec((8, _LANES), lambda i: (0, 0)),
                pl.BlockSpec((8, _LANES), lambda i: (0, 0)),
            ],
        ),
        compiler_params=pltpu.CompilerParams(
            dimension_semantics=("arbitrary",),
            vmem_limit_bytes=vmem_limit),
        cost_estimate=pl.CostEstimate(
            flops=12 * n_padded,
            transcendentals=n_padded,
            bytes_accessed=(n_padded * (p2.dtype.itemsize + g2.dtype.itemsize)
                            + 2 * 8 * _LANES * 4)),
    )(p2, g2)

    loss_sum = jnp.sum(loss_part)        # pos_loss + neg_loss
    num_pos = jnp.sum(npos_part)

    # TODO(synk): the PyTorch reference implicitly returns None when
    # num_pos == 0 (missing `return`); here we return -neg_loss instead
    # (pos_loss is exactly 0 in that case, so loss_sum == neg_loss).
    return jnp.where(num_pos == 0.0,
                     -loss_sum,
                     -loss_sum / jnp.maximum(num_pos, 1.0))


def _reference_focal_loss(pred, gt):
    """Pure-JAX mirror of _neg_loss."""
    pred = pred.astype(jnp.float32)
    gt = gt.astype(jnp.float32)
    pos_inds = (gt == 1.0).astype(jnp.float32)
    neg_inds = (gt < 1.0).astype(jnp.float32)
    neg_weights = (1.0 - gt) ** 4
    pos_loss = jnp.sum(jnp.log(pred) * (1.0 - pred) ** 2 * pos_inds)
    neg_loss = jnp.sum(jnp.log(1.0 - pred) * pred ** 2 * neg_weights * neg_inds)
    num_pos = jnp.sum(pos_inds)
    return jnp.where(num_pos == 0.0,
                     -neg_loss,
                     -(pos_loss + neg_loss) / jnp.maximum(num_pos, 1.0))


def _make_inputs(key, shape, peak_frac=0.97):
    k1, k2, k3 = jax.random.split(key, 3)
    pred = jax.nn.sigmoid(jax.random.normal(k1, shape, dtype=jnp.float32))
    pred = jnp.clip(pred, 1e-4, 1.0 - 1e-4)
    gt_soft = jax.random.uniform(k2, shape, dtype=jnp.float32, maxval=0.99)
    gt = jnp.where(jax.random.uniform(k3, shape) > peak_frac, 1.0, gt_soft)
    return pred, gt


if __name__ == "__main__":
    key = jax.random.PRNGKey(0)
    keys = jax.random.split(key, 3)

    # Case 1: (batch, c, h) exactly like the PyTorch module; auto block size
    # (single fully-valid block).
    pred, gt = _make_inputs(keys[0], (2, 8, 128))
    out = focal_loss(pred, gt)
    jax.block_until_ready(out)
    ref = _reference_focal_loss(pred, gt)
    assert jnp.allclose(out, ref, rtol=1e-4, atol=1e-5), (out, ref)

    # Case 2: h not a multiple of 128 and a ragged row count -> exercises the
    # zero lane-padding and the masked tail tile (forced tiny tiles).
    pred_b, gt_b = _make_inputs(keys[1], (3, 5, 96))
    out_b = focal_loss(pred_b, gt_b, tile_rows=8)
    jax.block_until_ready(out_b)
    ref_b = _reference_focal_loss(pred_b, gt_b)
    assert jnp.allclose(out_b, ref_b, rtol=1e-4, atol=1e-5), (out_b, ref_b)

    # Case 3: multi-tile fast path (rows divisible by the tile) + accumulation
    # across grid steps into the resident (8,128) outputs.
    pred_c, gt_c = _make_inputs(keys[2], (2, 16, 128))
    out_c = focal_loss(pred_c, gt_c, tile_rows=8)
    jax.block_until_ready(out_c)
    ref_c = _reference_focal_loss(pred_c, gt_c)
    assert jnp.allclose(out_c, ref_c, rtol=1e-4, atol=1e-5), (out_c, ref_c)

    print("KERNEL_OK")
</pallas_src>

<mosaic_0001>
module attributes {stable_mosaic.version = 11 : i64} {
  func.func @kernel(%arg0: i32, %arg1: memref<16x128xf32, #tpu.memory_space<vmem>>, %arg2: memref<16x128xf32, #tpu.memory_space<vmem>>, %arg3: memref<8x128xf32, #tpu.memory_space<vmem>>, %arg4: memref<8x128xf32, #tpu.memory_space<vmem>>) attributes {dimension_semantics = [#tpu.dimension_semantics<arbitrary>], iteration_bounds = array<i64: 1>, scalar_prefetch = 0 : i64, scratch_operands = 0 : i64, tpu.core_type = #tpu.core_type<tc>, window_params = [{transform_indices = @transform_0, window_bounds = array<i64: 16, 128>}, {transform_indices = @transform_1, window_bounds = array<i64: 16, 128>}, {pipeline_mode = #tpu.pipeline_mode<synchronous>, transform_indices = @transform_2, window_bounds = array<i64: 8, 128>}, {pipeline_mode = #tpu.pipeline_mode<synchronous>, transform_indices = @transform_3, window_bounds = array<i64: 8, 128>}]} {
    %c0_i32 = arith.constant 0 : i32
    %0 = arith.cmpi eq, %arg0, %c0_i32 : i32
    %1 = arith.extui %0 : i1 to i32
    %c0_i32_0 = arith.constant 0 : i32
    %2 = arith.cmpi ne, %1, %c0_i32_0 : i32
    scf.if %2 {
      %cst_18 = arith.constant 0.000000e+00 : f32
      %33 = vector.broadcast %cst_18 : f32 to vector<8x128xf32>
      %c0_19 = arith.constant 0 : index
      %c0_20 = arith.constant 0 : index
      %34 = vector.load %arg3[%c0_19, %c0_20] : memref<8x128xf32, #tpu.memory_space<vmem>>, vector<8x128xf32>
      tpu.vector_store %arg3[%c0_19, %c0_20], %33 {strides = array<i32>} : memref<8x128xf32, #tpu.memory_space<vmem>>, vector<8x128xf32>,
      %cst_21 = arith.constant 0.000000e+00 : f32
      %35 = vector.broadcast %cst_21 : f32 to vector<8x128xf32>
      %c0_22 = arith.constant 0 : index
      %c0_23 = arith.constant 0 : index
      %36 = vector.load %arg4[%c0_22, %c0_23] : memref<8x128xf32, #tpu.memory_space<vmem>>, vector<8x128xf32>
      tpu.vector_store %arg4[%c0_22, %c0_23], %35 {strides = array<i32>} : memref<8x128xf32, #tpu.memory_space<vmem>>, vector<8x128xf32>,
    } else {
    }
    %c0 = arith.constant 0 : index
    %c0_1 = arith.constant 0 : index
    %3 = vector.load %arg1[%c0, %c0_1] : memref<16x128xf32, #tpu.memory_space<vmem>>, vector<16x128xf32>
    %c0_2 = arith.constant 0 : index
    %c0_3 = arith.constant 0 : index
    %4 = vector.load %arg2[%c0_2, %c0_3] : memref<16x128xf32, #tpu.memory_space<vmem>>, vector<16x128xf32>
    %cst = arith.constant 1.000000e+00 : f32
    %5 = vector.broadcast %cst : f32 to vector<16x128xf32>
    %6 = arith.subf %5, %3 : vector<16x128xf32>
    %cst_4 = arith.constant 1.000000e+00 : f32
    %7 = vector.broadcast %cst_4 : f32 to vector<16x128xf32>
    %8 = arith.subf %7, %4 : vector<16x128xf32>
    %9 = arith.mulf %8, %8 : vector<16x128xf32>
    %10 = arith.mulf %9, %9 : vector<16x128xf32>
    %11 = arith.mulf %6, %6 : vector<16x128xf32>
    %12 = arith.mulf %3, %3 : vector<16x128xf32>
    %13 = arith.mulf %12, %10 : vector<16x128xf32>
    %cst_5 = arith.constant 1.000000e+00 : f32
    %14 = vector.broadcast %cst_5 : f32 to vector<16x128xf32>
    %15 = arith.cmpf oeq, %4, %14 : vector<16x128xf32>
    %16 = arith.select %15, %3, %6 : vector<16x128xi1>, vector<16x128xf32>
    %17 = arith.select %15, %11, %13 : vector<16x128xi1>, vector<16x128xf32>
    %18 = math.log %16 : vector<16x128xf32>
    %19 = arith.mulf %18, %17 : vector<16x128xf32>
    %cst_6 = arith.constant 1.000000e+00 : f32
    %cst_7 = arith.constant 0.000000e+00 : f32
    %20 = vector.broadcast %cst_6 : f32 to vector<16x128xf32>
    %21 = vector.broadcast %cst_7 : f32 to vector<16x128xf32>
    %22 = arith.select %15, %20, %21 : vector<16x128xi1>, vector<16x128xf32>
    %23 = vector.shape_cast %19 : vector<16x128xf32> to vector<2x8x128xf32>
    %cst_8 = arith.constant dense<0.000000e+00> : vector<8x128xf32>
    %24 = vector.multi_reduction <add>, %23, %cst_8 [0] : vector<2x8x128xf32> to vector<8x128xf32>
    %25 = vector.shape_cast %22 : vector<16x128xf32> to vector<2x8x128xf32>
    %cst_9 = arith.constant dense<0.000000e+00> : vector<8x128xf32>
    %26 = vector.multi_reduction <add>, %25, %cst_9 [0] : vector<2x8x128xf32> to vector<8x128xf32>
    %c0_10 = arith.constant 0 : index
    %c0_11 = arith.constant 0 : index
    %27 = vector.load %arg3[%c0_10, %c0_11] : memref<8x128xf32, #tpu.memory_space<vmem>>, vector<8x128xf32>
    %28 = arith.addf %27, %24 : vector<8x128xf32>
    %c0_12 = arith.constant 0 : index
    %c0_13 = arith.constant 0 : index
    %29 = vector.load %arg3[%c0_12, %c0_13] : memref<8x128xf32, #tpu.memory_space<vmem>>, vector<8x128xf32>
    tpu.vector_store %arg3[%c0_12, %c0_13], %28 {strides = array<i32>} : memref<8x128xf32, #tpu.memory_space<vmem>>, vector<8x128xf32>,
    %c0_14 = arith.constant 0 : index
    %c0_15 = arith.constant 0 : index
    %30 = vector.load %arg4[%c0_14, %c0_15] : memref<8x128xf32, #tpu.memory_space<vmem>>, vector<8x128xf32>
    %31 = arith.addf %30, %26 : vector<8x128xf32>
    %c0_16 = arith.constant 0 : index
    %c0_17 = arith.constant 0 : index
    %32 = vector.load %arg4[%c0_16, %c0_17] : memref<8x128xf32, #tpu.memory_space<vmem>>, vector<8x128xf32>
    tpu.vector_store %arg4[%c0_16, %c0_17], %31 {strides = array<i32>} : memref<8x128xf32, #tpu.memory_space<vmem>>, vector<8x128xf32>,
    return
  }
  func.func @transform_0(%arg0: i32) -> (i32, i32) {
    %c0_i32 = arith.constant 0 : i32
    %c0_i32_0 = arith.constant 0 : i32
    return %arg0, %c0_i32 : i32, i32
  }
  func.func @transform_1(%arg0: i32) -> (i32, i32) {
    %c0_i32 = arith.constant 0 : i32
    %c0_i32_0 = arith.constant 0 : i32
    return %arg0, %c0_i32 : i32, i32
  }
  func.func @transform_2(%arg0: i32) -> (i32, i32) {
    %c0_i32 = arith.constant 0 : i32
    %c0_i32_0 = arith.constant 0 : i32
    %c0_i32_1 = arith.constant 0 : i32
    return %c0_i32, %c0_i32_0 : i32, i32
  }
  func.func @transform_3(%arg0: i32) -> (i32, i32) {
    %c0_i32 = arith.constant 0 : i32
    %c0_i32_0 = arith.constant 0 : i32
    %c0_i32_1 = arith.constant 0 : i32
    return %c0_i32, %c0_i32_0 : i32, i32
  }
}

</mosaic_0001>

<bundles_post_ra>
// kernel: tpu_custom_call.1
= control target key start
LH: loop header
LB: loop body
LE: loop exit
PB: predicated region body
PF: predicated region fallthrough
CT: control target
= control target key end

     0   :  { %9 = vsyncpa [#allocation3], 0  ;;  %s287_s0 = inlined_call_operand.hbm [shape: f32[16,128], index: 0, kind: input, shape index: {}]   ;;  %s288_s1 = inlined_call_operand.hbm [shape: f32[16,128], index: 1, kind: input, shape index: {}]   ;;  %s289_s2 = inlined_call_operand.hbm [shape: f32[8,128], index: 2, kind: output, shape index: {0}]   ;;  %s290_s3 = inlined_call_operand.hbm [shape: f32[8,128], index: 3, kind: output, shape index: {1}]  }
   0x1   :  { %10 = vsyncpa [#allocation6], 0 }
   0x2   :  { %11 = vsyncpa [#allocation4], 0 }
   0x3   :  { %12 = vsyncpa [#allocation9], 0  ;;  %s17_s14 = sshll.u32 %s287_s0, 4  ;;  %s242_s15 = smov [#allocation2]   ;;  %s18_s14 = int_to_ptr.hbm [resolvable:$true] %s17_s14 }
   0x4   :  { %s19_s16 = sshll.u32 %s242_s15, 4  ;;  %s30_s19 = sshll.u32 %s288_s1, 4  ;;  %s20_s16 = int_to_ptr.vmem [resolvable:$true] %s19_s16  ;;  %s31_s19 = int_to_ptr.hbm [resolvable:$true] %s30_s19 }
   0x5   :  { %s243_s20 = smov 128   ;;  %s244_s21 = smov 8  }
   0x6   :  { %25 = dma.hbm_to_vmem [thread:$0]  %s18_s14, 256, %s20_s16, [#allocation3], %s243_s20, %s243_s20, %s244_s21  }
   0x7   :  { %s245_s22 = smov [#allocation5]  }
   0x8   :  { %s32_s23 = sshll.u32 %s245_s22, 4  ;;  %s33_s23 = int_to_ptr.vmem [resolvable:$true] %s32_s23 }
   0x9   :  { %38 = dma.hbm_to_vmem [thread:$0]  %s31_s19, 256, %s33_s23, [#allocation6], %s243_s20, %s243_s20, %s244_s21  }
   0xa   :  { %234 = dma.done.wait [#allocation3], 256  }
   0xb   :  { %235 = vsyncadd [#allocation3], 4294967040 }
   0xc   :  { %236 = dma.done.wait [#allocation6], 256  }
   0xd   :  { %237 = vsyncadd [#allocation6], 4294967040  ;;  %v53_v0 = vld [vmem:[#allocation2] sm:$0xff]  ;;  %v54_v1 = vld [vmem:[#allocation2 + $0x8] sm:$0xff]  ;;  %v246_v14 = vmov 0.0   ;;  %s247_s0 = smov [#allocation8]  }
   0xe   :  { %v55_v2 = vld [vmem:[#allocation5] sm:$0xff]  ;;  %v56_v3 = vld [vmem:[#allocation5 + $0x8] sm:$0xff]  ;;  %v57_v4 = vsub.f32 1.0, %v53_v0  ;;  %v58_v5 = vsub.f32 1.0, %v54_v1  ;;  %v67_v9 = vmul.f32 %v53_v0, %v53_v0  ;;  %v68_v10 = vmul.f32 %v54_v1, %v54_v1  ;;  %s109_s1 = sshll.u32 %s247_s0, 4  ;;  %s111_s26 = sshll.u32 %s290_s3, 4  ;;  %s110_s1 = int_to_ptr.vmem [resolvable:$true] %s109_s1  ;;  %s112_s26 = int_to_ptr.hbm [resolvable:$true] %s111_s26 }
   0xf   :  { %v59_v6 = vsub.f32 1.0, %v55_v2  ;;  %v60_v7 = vsub.f32 1.0, %v56_v3  ;;  %vm71_vm0 = vcmp.eq.f32.partialorder %v55_v2, 1.0  ;;  %vm72_vm1 = vcmp.eq.f32.partialorder %v56_v3, 1.0  ;;  %s248_s3 = smov [#allocation7]   ;;  %s100_s30 = sshll.u32 %s289_s2, 4  ;;  %s101_s30 = int_to_ptr.hbm [resolvable:$true] %s100_s30 }
  0x10   :  { %v73_v11 = vsel %vm71_vm0, %v53_v0, %v57_v4  ;;  %v74_v13 = vsel %vm72_vm1, %v54_v1, %v58_v5  ;;  %v83_v15 = vsel %vm71_vm0, 1.0, %v246_v14  ;;  %v84_v17 = vsel %vm72_vm1, 1.0, %v246_v14  ;;  %s98_s27 = sshll.u32 %s248_s3, 4  ;;  %s99_s27 = int_to_ptr.vmem [resolvable:$true] %s98_s27 }
  0x11   :  { %v61_v8 = vmul.f32 %v59_v6, %v59_v6  ;;  %v62_v12 = vmul.f32 %v60_v7, %v60_v7  ;;  %134 = vlog2.f32 %v73_v11  ;;  %v65_v19 = vmul.f32 %v57_v4, %v57_v4 }
  0x12   :  { %136 = vlog2.f32 %v74_v13  ;;  %v86_v20 = vadd.f32 %v84_v17, %v83_v15  ;;  %v66_v21 = vmul.f32 %v58_v5, %v58_v5 }
  0x13   :  { %v63_v16 = vmul.f32 %v61_v8, %v61_v8  ;;  %v64_v18 = vmul.f32 %v62_v12, %v62_v12 }
  0x14   :  { %92 = vst [vmem:[#allocation8] sm:$0xff] %v86_v20 }
  0x15   :  { %v69_v22 = vmul.f32 %v67_v9, %v63_v16  ;;  %v70_v23 = vmul.f32 %v68_v10, %v64_v18  ;;  %114 = dma.vmem_to_hbm [thread:$0]  %s110_s1, 128, %s112_s26, [#allocation9]  }
  0x17   :  { %v135_v24 = vpop.eup %134  ;;  %v75_v25 = vsel %vm71_vm0, %v65_v19, %v69_v22  ;;  %v76_v27 = vsel %vm72_vm1, %v66_v21, %v70_v23 }
  0x18   :  { %v137_v26 = vpop.eup %136  ;;  %v78_v28 = vmul.f32 0.6931472, %v135_v24 }
  0x19   :  { %v80_v29 = vmul.f32 0.6931472, %v137_v26 }
  0x1a   :  { %v81_v30 = vmul.f32 %v78_v28, %v75_v25 }
  0x1b   :  { %v82_v31 = vmul.f32 %v80_v29, %v76_v27 }
  0x1d   :  { %v85_v32 = vadd.f32 %v82_v31, %v81_v30 }
  0x1f   :  { %89 = vst [vmem:[#allocation7] sm:$0xff] %v85_v32 }
  0x20   :  { %103 = dma.vmem_to_hbm [thread:$0]  %s99_s27, 128, %s101_s30, [#allocation4]  }
  0x21   :  { %238 = dma.done.wait [#allocation4], 128  }
  0x22   :  { %239 = vsyncadd [#allocation4], 4294967168 }
  0x23   :  { %240 = dma.done.wait [#allocation9], 128  }
  0x24   :  { %241 = vsyncadd [#allocation9], 4294967168 }
  0x25   :  { %123 = vsyncpa [#allocation3], 1 }
  0x26   :  { %124 = vsyncpa [#allocation6], 1 }
  0x27   :  { %125 = vsyncpa [#allocation4], 1 }
  0x28   :  { %126 = vsyncpa [#allocation9], 1 }

</bundles_post_ra>
